<compile_context>
chip_gen: v6e
topology: v6e:2x2x1
jax: 0.10.0
libtpu: 0.0.40
codegen_flags: <defaults>
</compile_context>

<pallas_src>
import jax
import jax.numpy as jnp
from jax.experimental import pallas as pl
from jax.experimental.pallas import tpu as pltpu

LANES = 128        # vreg lane width: last block dim
SUBLANES = 8       # vreg sublane count: second-to-last block dim granularity
TILE_ROWS = 4096   # (4096, 128) f32 = 2 MiB per block; 2 arrays x 2 buffers = 8 MiB VMEM


def _logreg_kernel(wb_ref, x_ref, o_ref):
    # wb_ref: (2,) f32 in SMEM -> [weight, bias] scalars.
    # x_ref, o_ref: (tr, 128) f32 tiles in VMEM (lane-dense view of the batch).
    w = wb_ref[0]
    b = wb_ref[1]
    z = x_ref[...] * w + b              # Linear(1, 1): x @ W^T + b  ==  x * w + b (VPU)
    o_ref[...] = jax.nn.sigmoid(z)      # exp on the EUP; HBM DMA is the real bottleneck


def logistic_regression(x, weight, bias, *, tile_rows=TILE_ROWS):
    """x: (..., 1) or (N,) f32; weight: (1, 1); bias: (1,) -> same shape as x."""
    orig_shape = x.shape
    xf = x.reshape(-1).astype(jnp.float32)
    n = xf.shape[0]
    if n == 0:  # guard empty input (avoids zero-sized grid / division by zero)
        return jnp.zeros(orig_shape, jnp.float32)

    # Round the flat length up to a whole (8, 128) tile so the 2-D view is tile-aligned.
    # When n is already a multiple of 1024 the pad and the final slice are no-ops that
    # XLA removes entirely; otherwise the tail pad is < 1024 elements.
    tile_elems = SUBLANES * LANES
    total = pl.cdiv(n, tile_elems) * tile_elems
    xp = xf if total == n else jnp.pad(xf, (0, total - n))
    rows = total // LANES                      # multiple of 8
    x2 = xp.reshape(rows, LANES)               # lane-dense slab; layout-preserving

    # Row tile: multiple of 8, capped at tile_rows and at the array extent, sized so
    # the grid has >= 4 steps when possible (>= 2 per TensorCore on v7x megacore).
    target_steps = 4
    tr = max(SUBLANES, pl.cdiv(pl.cdiv(rows, target_steps), SUBLANES) * SUBLANES)
    tr = min(tile_rows, tr, rows)
    grid = (pl.cdiv(rows, tr),)                # last block may be partial -> masked

    # Pack the two Linear(1, 1) parameters into one tiny 1-D SMEM array.
    wb = jnp.concatenate([weight.reshape(-1), bias.reshape(-1)]).astype(jnp.float32)

    out = pl.pallas_call(
        _logreg_kernel,
        out_shape=jax.ShapeDtypeStruct((rows, LANES), jnp.float32),
        grid=grid,
        in_specs=[
            pl.BlockSpec(memory_space=pltpu.SMEM),         # (2,) scalars, replicated
            pl.BlockSpec((tr, LANES), lambda i: (i, 0)),   # lane-dense input tiles
        ],
        out_specs=pl.BlockSpec((tr, LANES), lambda i: (i, 0)),
        compiler_params=pltpu.CompilerParams(
            # Purely data-parallel over the batch: let v7x's two TensorCores split it.
            dimension_semantics=("parallel",),
        ),
    )(wb, x2)

    y = out.reshape(-1)
    if total != n:
        y = y[:n]
    return y.reshape(orig_shape)


if __name__ == "__main__":
    # Deterministic parameter init (shapes from nn.Linear(1, 1)).
    key = jax.random.PRNGKey(0)
    kw, kb = jax.random.split(key, 2)
    weight = jax.random.uniform(kw, (1, 1), jnp.float32, -1.0, 1.0)
    bias = jax.random.uniform(kb, (1,), jnp.float32, -1.0, 1.0)

    # Input consistent with the script: x = np.linspace(0, 10, 200), shape (200, 1).
    x = jnp.linspace(0.0, 10.0, 200, dtype=jnp.float32).reshape(-1, 1)

    y = jax.block_until_ready(logistic_regression(x, weight, bias))

    # Reference check in plain JAX.
    y_ref = jax.nn.sigmoid(x @ weight.T + bias)
    assert y.shape == (200, 1)
    assert jnp.allclose(y, y_ref, atol=1e-5), "mismatch vs reference"
    print("KERNEL_OK")
</pallas_src>

<mosaic_0001>
module attributes {stable_mosaic.version = 11 : i64} {
  func.func @_logreg_kernel(%arg0: i32, %arg1: memref<2xf32, #tpu.memory_space<smem>>, %arg2: memref<8x128xf32, #tpu.memory_space<vmem>>, %arg3: memref<8x128xf32, #tpu.memory_space<vmem>>) attributes {dimension_semantics = [#tpu.dimension_semantics<parallel>], iteration_bounds = array<i64: 1>, scalar_prefetch = 0 : i64, scratch_operands = 0 : i64, tpu.core_type = #tpu.core_type<tc>, window_params = [{transform_indices = @transform_0, window_bounds = array<i64: 2>}, {transform_indices = @transform_1, window_bounds = array<i64: 8, 128>}, {transform_indices = @transform_2, window_bounds = array<i64: 8, 128>}]} {
    %c0 = arith.constant 0 : index
    %0 = memref.load %arg1[%c0] : memref<2xf32, #tpu.memory_space<smem>>
    %c1 = arith.constant 1 : index
    %1 = memref.load %arg1[%c1] : memref<2xf32, #tpu.memory_space<smem>>
    %c0_0 = arith.constant 0 : index
    %c0_1 = arith.constant 0 : index
    %2 = vector.load %arg2[%c0_0, %c0_1] : memref<8x128xf32, #tpu.memory_space<vmem>>, vector<8x128xf32>
    %3 = vector.broadcast %0 : f32 to vector<8x128xf32>
    %4 = arith.mulf %2, %3 : vector<8x128xf32>
    %5 = vector.broadcast %1 : f32 to vector<8x128xf32>
    %6 = arith.addf %4, %5 : vector<8x128xf32>
    %7 = arith.negf %6 : vector<8x128xf32>
    %8 = math.exp %7 : vector<8x128xf32>
    %cst = arith.constant 1.000000e+00 : f32
    %9 = vector.broadcast %cst : f32 to vector<8x128xf32>
    %10 = arith.addf %9, %8 : vector<8x128xf32>
    %11 = arith.divf %9, %10 : vector<8x128xf32>
    %c0_2 = arith.constant 0 : index
    %c0_3 = arith.constant 0 : index
    %12 = vector.load %arg3[%c0_2, %c0_3] : memref<8x128xf32, #tpu.memory_space<vmem>>, vector<8x128xf32>
    tpu.vector_store %arg3[%c0_2, %c0_3], %11 {strides = array<i32>} : memref<8x128xf32, #tpu.memory_space<vmem>>, vector<8x128xf32>,
    return
  }
  func.func @transform_0(%arg0: i32) -> i32 {
    %c0_i32 = arith.constant 0 : i32
    %c0_i32_0 = arith.constant 0 : i32
    return %c0_i32 : i32
  }
  func.func @transform_1(%arg0: i32) -> (i32, i32) {
    %c0_i32 = arith.constant 0 : i32
    %c0_i32_0 = arith.constant 0 : i32
    return %arg0, %c0_i32 : i32, i32
  }
  func.func @transform_2(%arg0: i32) -> (i32, i32) {
    %c0_i32 = arith.constant 0 : i32
    %c0_i32_0 = arith.constant 0 : i32
    return %arg0, %c0_i32 : i32, i32
  }
}

</mosaic_0001>

<bundles_post_ra>
// kernel: tpu_custom_call.1
= control target key start
LH: loop header
LB: loop body
LE: loop exit
PB: predicated region body
PF: predicated region fallthrough
CT: control target
= control target key end

     0   :  { %7 = vsyncpa [#allocation5], 0  ;;  %s155_s0 = inlined_call_operand.hbm [shape: f32[2], index: 0, kind: input, shape index: {}]   ;;  %s156_s1 = inlined_call_operand.hbm [shape: f32[8,128], index: 1, kind: input, shape index: {}]   ;;  %s157_s2 = inlined_call_operand.hbm [shape: f32[8,128], index: 2, kind: output, shape index: {}]  }
   0x1   :  { %8 = vsyncpa [#allocation3], 0 }
   0x2   :  { %9 = vsyncpa [#allocation4], 0  ;;  %s128_s9 = smov [#allocation2]   ;;  %s129_s12 = smov [#allocation6]  }
   0x3   :  { %17 = dma.hbm_to_smem %s155_s0, 16, %s128_s9, [#allocation5]  }
   0x4   :  { %s24_s13 = sshll.u32 %s129_s12, 4  ;;  %s25_s13 = int_to_ptr.vmem [resolvable:$true] %s24_s13 }
   0x5   :  { %s90_s14 = scalar_lea.vmem %s25_s13, 128  ;;  %p95_p1 = scmp.lt.s32.totalorder %s25_s13, %s25_s13 }
   0x6   :  { %p91_p0 = scmp.ne.s32.totalorder %s25_s13, %s90_s14  ;;  %p96_p2 = scmp.lt.s32.totalorder %s90_s14, %s90_s14 }
   0x8   :  { %p97_p3 = por %p96_p2, %p95_p1 }
   0xa   :  { %p98_p4 = pnand %p97_p3, %p91_p0 }
   0xc   :  { %101 = shalt.err (!%p98_p4)
}
   0xd   :  { %27 = dma.hbm_to_vmem [thread:$0]  %s156_s1, 128, %s25_s13, [#allocation3]  }
   0xe   :  { %122 = dma.done.wait [#allocation5], 16  }
   0xf   :  { %123 = vsyncadd [#allocation5], 4294967280 }
  0x10   :  { %124 = dma.done.wait [#allocation3], 128  }
  0x11   :  { %125 = vsyncadd [#allocation3], 4294967168 }
  0x12   :  { %34 = sfence }
  0x13   :  { %s35_s0 = sld [smem:[#allocation2]]  ;;  %v37_v0 = vld [vmem:[#allocation6] sm:$0xff]  ;;  %s130_s18 = smov [#allocation7]  }
  0x14   :  { %s65_s17 = sld [smem:[#allocation2 + $0x1]]  ;;  %s55_s19 = sshll.u32 %s130_s18, 4  ;;  %s56_s19 = int_to_ptr.vmem [resolvable:$true] %s55_s19 }
  0x15   :  { %s102_s1 = scalar_lea.vmem %s56_s19, 128  ;;  %p107_p6 = scmp.lt.s32.totalorder %s56_s19, %s56_s19 }
  0x16   :  { %p103_p5 = scmp.ne.s32.totalorder %s56_s19, %s102_s1  ;;  %p108_p7 = scmp.lt.s32.totalorder %s102_s1, %s102_s1 }
  0x18   :  { %p109_p8 = por %p108_p7, %p107_p6 }
  0x19   :  { %v38_v1 = vstv %s35_s0 }
  0x1a   :  { %v39_v2 = vmul.f32 %v38_v1, %v37_v0  ;;  %v40_v3 = vstv %s65_s17  ;;  %p110_p9 = pnand %p109_p8, %p103_p5 }
  0x1c   :  { %v41_v4 = vadd.f32 %v40_v3, %v39_v2 }
  0x1e   :  { %v66_v5 = vmul.f32 -1.442695, %v41_v4 }
  0x20   :  { %70 = vpow2.f32 %v66_v5 }
  0x2d   :  { %v71_v6 = vpop.eup %70 }
  0x2e   :  { %v45_v7 = vadd.f32 1.0, %v71_v6 }
  0x30   :  { %72 = vrcp.f32 %v45_v7 }
  0x3d   :  { %v73_v8 = vpop.eup %72 }
  0x3e   :  { %48 = vst [vmem:[#allocation7] sm:$0xff] %v73_v8 }
  0x3f   :  { %113 = shalt.err (!%p110_p9)
}
  0x40   :  { %58 = dma.vmem_to_hbm [thread:$0]  %s56_s19, 128, %s157_s2, [#allocation4]  }
  0x41   :  { %126 = dma.done.wait [#allocation4], 128  }
  0x42   :  { %127 = vsyncadd [#allocation4], 4294967168 }
  0x43   :  { %62 = vsyncpa [#allocation3], 1 }
  0x44   :  { %63 = vsyncpa [#allocation4], 1 }
  0x45   :  { %64 = vsyncpa [#allocation5], 1 }

</bundles_post_ra>
